<compile_context>
chip_gen: v6e
topology: v6e:2x2x1
jax: 0.10.0
libtpu: 0.0.40
codegen_flags: <defaults>
</compile_context>

<pallas_src>
import functools
import math

import jax
import jax.numpy as jnp
from jax.experimental import pallas as pl
from jax.experimental.pallas import tpu as pltpu


# ----------------------------------------------------------------------------
# Tile-size helper: largest divisor of `dim` that is a multiple of `align`
# and <= max_tile; falls back to the full dim (always BlockSpec-legal).
# ----------------------------------------------------------------------------
def _pick_tile(dim, max_tile, align):
    if dim % align != 0 or dim <= align:
        return dim
    t = min(max_tile, dim)
    t -= t % align
    while dim % t != 0:
        t -= align
    return t


def _gelu_tanh(x):
    # TODO(synk): DINOv2/timm use exact erf-GELU; tanh approximation used here.
    c = jnp.float32(math.sqrt(2.0 / math.pi))
    return 0.5 * x * (1.0 + jnp.tanh(c * (x + 0.044715 * x * x * x)))


# ----------------------------------------------------------------------------
# Pallas kernels
# ----------------------------------------------------------------------------
def _matmul_bias_kernel(x_ref, w_ref, b_ref, o_ref, acc_ref):
    k = pl.program_id(2)

    @pl.when(k == 0)
    def _():
        acc_ref[...] = jnp.zeros_like(acc_ref)

    acc_ref[...] += jnp.dot(x_ref[...], w_ref[...],
                            preferred_element_type=jnp.float32)

    @pl.when(k == pl.num_programs(2) - 1)
    def _():
        out = acc_ref[...] + b_ref[...].astype(jnp.float32)
        o_ref[...] = out.astype(o_ref.dtype)


def _matmul_bias_res_kernel(x_ref, w_ref, b_ref, r_ref, o_ref, acc_ref):
    k = pl.program_id(2)

    @pl.when(k == 0)
    def _():
        acc_ref[...] = jnp.zeros_like(acc_ref)

    acc_ref[...] += jnp.dot(x_ref[...], w_ref[...],
                            preferred_element_type=jnp.float32)

    @pl.when(k == pl.num_programs(2) - 1)
    def _():
        out = (acc_ref[...] + b_ref[...].astype(jnp.float32)
               + r_ref[...].astype(jnp.float32))
        o_ref[...] = out.astype(o_ref.dtype)


def _ln_matmul_bias_kernel(x_ref, g_ref, bln_ref, w_ref, b_ref, o_ref,
                           *, eps, gelu):
    # LayerNorm (f32) fused with the consuming matmul (bf16 MXU operands).
    x = x_ref[...].astype(jnp.float32)
    mu = jnp.mean(x, axis=-1, keepdims=True)
    var = jnp.mean((x - mu) * (x - mu), axis=-1, keepdims=True)
    xn = (x - mu) * jax.lax.rsqrt(var + eps)
    xn = xn * g_ref[...].astype(jnp.float32) + bln_ref[...].astype(jnp.float32)
    acc = jnp.dot(xn.astype(w_ref.dtype), w_ref[...],
                  preferred_element_type=jnp.float32)
    acc = acc + b_ref[...].astype(jnp.float32)
    if gelu:
        acc = _gelu_tanh(acc)
    o_ref[...] = acc.astype(o_ref.dtype)


def _layernorm_kernel(x_ref, g_ref, b_ref, o_ref, *, eps):
    x = x_ref[...].astype(jnp.float32)
    mu = jnp.mean(x, axis=-1, keepdims=True)
    var = jnp.mean((x - mu) * (x - mu), axis=-1, keepdims=True)
    y = (x - mu) * jax.lax.rsqrt(var + eps)
    o_ref[...] = (y * g_ref[...].astype(jnp.float32)
                  + b_ref[...].astype(jnp.float32)).astype(o_ref.dtype)


def _flash_attn_kernel(q_ref, k_ref, v_ref, o_ref, m_sc, l_sc, acc_sc,
                       *, scale):
    kv = pl.program_id(2)

    @pl.when(kv == 0)
    def _():
        m_sc[...] = jnp.full_like(m_sc, -jnp.inf)
        l_sc[...] = jnp.zeros_like(l_sc)
        acc_sc[...] = jnp.zeros_like(acc_sc)

    # Fold the softmax scale into q (tq x Dh mul, not tq x tk).
    q = (q_ref[...].astype(jnp.float32) * scale).astype(q_ref.dtype)
    s = jnp.einsum('bqd,bkd->bqk', q, k_ref[...],
                   preferred_element_type=jnp.float32)
    m_new = jnp.maximum(m_sc[...], jnp.max(s, axis=-1, keepdims=True))
    alpha = jnp.exp(m_sc[...] - m_new)
    p = jnp.exp(s - m_new)
    l_sc[...] = alpha * l_sc[...] + jnp.sum(p, axis=-1, keepdims=True)
    acc_sc[...] = alpha * acc_sc[...] + jnp.einsum(
        'bqk,bkd->bqd', p.astype(v_ref.dtype), v_ref[...],
        preferred_element_type=jnp.float32)
    m_sc[...] = m_new

    @pl.when(kv == pl.num_programs(2) - 1)
    def _():
        o_ref[...] = (acc_sc[...] *
                      pl.reciprocal(l_sc[...], approx=True)).astype(o_ref.dtype)


# ----------------------------------------------------------------------------
# Pallas wrappers
# ----------------------------------------------------------------------------
def pallas_matmul_bias(x, w, b, residual=None, out_dtype=jnp.bfloat16):
    """y = x @ w + b (+ residual), tiled with a K-axis accumulator."""
    M, K = x.shape
    N = w.shape[1]
    tm = _pick_tile(M, 256, 8)
    tn = _pick_tile(N, 512, 128)
    tk = _pick_tile(K, 512, 128)
    grid = (M // tm, N // tn, K // tk)

    in_specs = [
        pl.BlockSpec((tm, tk), lambda i, j, k: (i, k)),
        pl.BlockSpec((tk, tn), lambda i, j, k: (k, j)),
        pl.BlockSpec((1, tn), lambda i, j, k: (0, j)),
    ]
    args = [x, w, b.reshape(1, N)]
    if residual is not None:
        in_specs.append(pl.BlockSpec((tm, tn), lambda i, j, k: (i, j)))
        args.append(residual)
        kern = _matmul_bias_res_kernel
    else:
        kern = _matmul_bias_kernel

    return pl.pallas_call(
        kern,
        out_shape=jax.ShapeDtypeStruct((M, N), out_dtype),
        grid=grid,
        in_specs=in_specs,
        out_specs=pl.BlockSpec((tm, tn), lambda i, j, k: (i, j)),
        scratch_shapes=[pltpu.VMEM((tm, tn), jnp.float32)],
        compiler_params=pltpu.CompilerParams(
            dimension_semantics=("parallel", "parallel", "arbitrary")),
    )(*args)


def pallas_ln_matmul_bias(x, gamma, beta, w, b, gelu=False, eps=1e-6,
                          out_dtype=jnp.bfloat16):
    """y = (LayerNorm(x) @ w + b), optional fused GELU. K untiled (LN row)."""
    M, K = x.shape
    N = w.shape[1]
    tm = _pick_tile(M, 256, 8)
    tn = _pick_tile(N, 512, 128)
    grid = (M // tm, N // tn)

    return pl.pallas_call(
        functools.partial(_ln_matmul_bias_kernel, eps=eps, gelu=gelu),
        out_shape=jax.ShapeDtypeStruct((M, N), out_dtype),
        grid=grid,
        in_specs=[
            pl.BlockSpec((tm, K), lambda i, j: (i, 0)),
            pl.BlockSpec((1, K), lambda i, j: (0, 0)),
            pl.BlockSpec((1, K), lambda i, j: (0, 0)),
            pl.BlockSpec((K, tn), lambda i, j: (0, j)),
            pl.BlockSpec((1, tn), lambda i, j: (0, j)),
        ],
        out_specs=pl.BlockSpec((tm, tn), lambda i, j: (i, j)),
        compiler_params=pltpu.CompilerParams(
            dimension_semantics=("parallel", "parallel")),
    )(x, gamma.reshape(1, K), beta.reshape(1, K), w, b.reshape(1, N))


def pallas_layernorm(x, gamma, beta, eps=1e-6, out_dtype=jnp.float16):
    """Row-tiled LayerNorm; writes the requested (half) dtype directly."""
    M, D = x.shape
    tm = _pick_tile(M, 1024, 8)
    return pl.pallas_call(
        functools.partial(_layernorm_kernel, eps=eps),
        out_shape=jax.ShapeDtypeStruct((M, D), out_dtype),
        grid=(M // tm,),
        in_specs=[
            pl.BlockSpec((tm, D), lambda i: (i, 0)),
            pl.BlockSpec((1, D), lambda i: (0, 0)),
            pl.BlockSpec((1, D), lambda i: (0, 0)),
        ],
        out_specs=pl.BlockSpec((tm, D), lambda i: (i, 0)),
        compiler_params=pltpu.CompilerParams(
            dimension_semantics=("parallel",)),
    )(x, gamma.reshape(1, D), beta.reshape(1, D))


def pallas_flash_attention(q, k, v, scale, out_dtype=jnp.bfloat16):
    """Online-softmax attention. q, k, v: (B*H, S, Dh)."""
    BH, S, Dh = q.shape
    tq = _pick_tile(S, 256, 8)
    tk = _pick_tile(S, 512, 8)
    grid = (BH, S // tq, S // tk)

    q_spec = pl.BlockSpec((1, tq, Dh), lambda b, qi, ki: (b, qi, 0))
    kv_spec = pl.BlockSpec((1, tk, Dh), lambda b, qi, ki: (b, ki, 0))

    return pl.pallas_call(
        functools.partial(_flash_attn_kernel, scale=scale),
        out_shape=jax.ShapeDtypeStruct((BH, S, Dh), out_dtype),
        grid=grid,
        in_specs=[q_spec, kv_spec, kv_spec],
        out_specs=pl.BlockSpec((1, tq, Dh), lambda b, qi, ki: (b, qi, 0)),
        scratch_shapes=[
            pltpu.VMEM((1, tq, 1), jnp.float32),   # running max
            pltpu.VMEM((1, tq, 1), jnp.float32),   # running denom
            pltpu.VMEM((1, tq, Dh), jnp.float32),  # output accumulator
        ],
        compiler_params=pltpu.CompilerParams(
            dimension_semantics=("parallel", "parallel", "arbitrary")),
    )(q, k, v)


# ----------------------------------------------------------------------------
# ViT feature model (DINOv2-style) built on the Pallas kernels
# ----------------------------------------------------------------------------
def init_vit_params(key, *, in_chans, patch_size, embed_dim, depth,
                    num_heads, mlp_ratio, num_patches):
    def nrm(k, shape, std=0.02, dtype=jnp.bfloat16):
        return (std * jax.random.normal(k, shape)).astype(dtype)

    keys = jax.random.split(key, 4 + depth)
    params = {
        # matmul weights in bf16 (MXU operands); LN params / biases in f32.
        'patch_w': nrm(keys[0], (in_chans * patch_size * patch_size, embed_dim)),
        'patch_b': jnp.zeros((embed_dim,), jnp.float32),
        'cls_token': nrm(keys[1], (1, 1, embed_dim), dtype=jnp.float32),
        'pos_embed': nrm(keys[2], (1, num_patches + 1, embed_dim),
                         dtype=jnp.float32),
        'norm_g': jnp.ones((embed_dim,), jnp.float32),
        'norm_b': jnp.zeros((embed_dim,), jnp.float32),
        'blocks': [],
    }
    hidden = int(embed_dim * mlp_ratio)
    for d in range(depth):
        bk = jax.random.split(keys[4 + d], 4)
        params['blocks'].append({
            'norm1_g': jnp.ones((embed_dim,), jnp.float32),
            'norm1_b': jnp.zeros((embed_dim,), jnp.float32),
            'qkv_w': nrm(bk[0], (embed_dim, 3 * embed_dim)),
            'qkv_b': jnp.zeros((3 * embed_dim,), jnp.float32),
            'proj_w': nrm(bk[1], (embed_dim, embed_dim)),
            'proj_b': jnp.zeros((embed_dim,), jnp.float32),
            'norm2_g': jnp.ones((embed_dim,), jnp.float32),
            'norm2_b': jnp.zeros((embed_dim,), jnp.float32),
            'fc1_w': nrm(bk[2], (embed_dim, hidden)),
            'fc1_b': jnp.zeros((hidden,), jnp.float32),
            'fc2_w': nrm(bk[3], (hidden, embed_dim)),
            'fc2_b': jnp.zeros((embed_dim,), jnp.float32),
        })
    return params


def patch_embed(images, params, patch_size):
    # images: NCHW, same patch ordering as Conv2d(C, D, P, stride=P).flatten(2)
    B, C, H, W = images.shape
    P = patch_size
    Hp, Wp = H // P, W // P
    x = images.reshape(B, C, Hp, P, Wp, P)
    x = jnp.transpose(x, (0, 2, 4, 1, 3, 5)).reshape(B * Hp * Wp, C * P * P)
    y = pallas_matmul_bias(x.astype(jnp.bfloat16),
                           params['patch_w'], params['patch_b'])
    return y.reshape(B, Hp * Wp, -1)


def transformer_block(x, bp, num_heads):
    B, S, D = x.shape
    Dh = D // num_heads
    scale = 1.0 / math.sqrt(Dh)
    x2 = x.reshape(B * S, D)

    # --- attention: fused LN -> QKV -> flash attention -> proj(+residual) ---
    qkv = pallas_ln_matmul_bias(x2, bp['norm1_g'], bp['norm1_b'],
                                bp['qkv_w'], bp['qkv_b'])        # (B*S, 3D)
    qkv = qkv.reshape(B, S, 3, num_heads, Dh)
    qkv = jnp.transpose(qkv, (2, 0, 3, 1, 4))                    # (3, B, H, S, Dh)
    q = qkv[0].reshape(B * num_heads, S, Dh)
    k = qkv[1].reshape(B * num_heads, S, Dh)
    v = qkv[2].reshape(B * num_heads, S, Dh)
    attn = pallas_flash_attention(q, k, v, scale)                # (B*H, S, Dh)
    attn = attn.reshape(B, num_heads, S, Dh)
    attn = jnp.transpose(attn, (0, 2, 1, 3)).reshape(B * S, D)
    x2 = pallas_matmul_bias(attn, bp['proj_w'], bp['proj_b'], residual=x2)

    # --- mlp: fused LN -> fc1 -> GELU, then fc2(+residual) ---
    h = pallas_ln_matmul_bias(x2, bp['norm2_g'], bp['norm2_b'],
                              bp['fc1_w'], bp['fc1_b'], gelu=True)
    x2 = pallas_matmul_bias(h, bp['fc2_w'], bp['fc2_b'], residual=x2)
    return x2.reshape(B, S, D)


def get_intermediate_layers(images, params, *, patch_size, num_heads,
                            n_last_blocks):
    """DINOv2-style get_intermediate_layers(..., return_class_token=True, norm=True)."""
    # TODO(synk): no positional-embedding interpolation; input H/W must match
    # the pos_embed grid (PyTorch DINOv2 interpolates for other sizes).
    B = images.shape[0]
    tokens = patch_embed(images, params, patch_size)             # (B, N, D) bf16
    D = tokens.shape[-1]
    cls = jnp.broadcast_to(params['cls_token'], (B, 1, D)).astype(tokens.dtype)
    x = (jnp.concatenate([cls, tokens], axis=1)
         + params['pos_embed']).astype(jnp.bfloat16)

    depth = len(params['blocks'])
    collected = []
    for i, bp in enumerate(params['blocks']):
        x = transformer_block(x, bp, num_heads)
        if i >= depth - n_last_blocks:
            collected.append(x)

    features = []
    for out in collected:
        B_, S_, D_ = out.shape
        # final LayerNorm writes float16 directly (autocast-half output).
        # TODO(synk): bf16 is the natural half dtype on TPU; f16 kept to match
        # the torch.cuda.amp.autocast(dtype=half) reference output dtype.
        normed = pallas_layernorm(out.reshape(B_ * S_, D_),
                                  params['norm_g'], params['norm_b'],
                                  out_dtype=jnp.float16)
        normed = normed.reshape(B_, S_, D_)
        patch_tokens = normed[:, 1:, :]
        cls_token = normed[:, 0, :]
        features.append((patch_tokens, cls_token))
    return tuple(features)


def model_with_intermediate_layers_forward(images, params, *, patch_size,
                                           num_heads, n_last_blocks,
                                           outputs='all'):
    """Equivalent of ModelWithIntermediateLayers.forward (eval, inference,
    autocast-half, timm_interface=False, no_inference=False)."""
    feats = get_intermediate_layers(images, params, patch_size=patch_size,
                                    num_heads=num_heads,
                                    n_last_blocks=n_last_blocks)
    if outputs == 'all':
        return feats
    elif outputs == 'cls_tkn':
        return feats[0][1]
    elif outputs == 'patch_tkn':
        return jnp.squeeze(jnp.stack([f[0] for f in feats]))
    elif outputs == 'patch_tkn_noimg':
        p = feats[0][0]
        return p.reshape(-1, p.shape[2])
    elif outputs == 'all_combined':
        return jnp.squeeze(jnp.stack(
            [jnp.concatenate([f[1][:, None, :], f[0]], axis=1) for f in feats]))
    else:
        raise ValueError(outputs)


# ----------------------------------------------------------------------------
if __name__ == "__main__":
    # small ViT config
    B, C, H, W = 2, 3, 16, 16
    PATCH = 8
    EMBED = 32
    HEADS = 2
    DEPTH = 3
    N_LAST = 2
    NUM_PATCHES = (H // PATCH) * (W // PATCH)

    key = jax.random.PRNGKey(0)
    k_img, k_par = jax.random.split(key)
    images = jax.random.normal(k_img, (B, C, H, W), dtype=jnp.float32)  # NCHW
    params = init_vit_params(k_par, in_chans=C, patch_size=PATCH,
                             embed_dim=EMBED, depth=DEPTH, num_heads=HEADS,
                             mlp_ratio=4.0, num_patches=NUM_PATCHES)

    feats = model_with_intermediate_layers_forward(
        images, params, patch_size=PATCH, num_heads=HEADS,
        n_last_blocks=N_LAST, outputs='all')

    feats = jax.block_until_ready(feats)

    # sanity: tuple of N_LAST (patch_tokens, cls_token) pairs
    assert len(feats) == N_LAST
    for p_tok, c_tok in feats:
        assert p_tok.shape == (B, NUM_PATCHES, EMBED)
        assert c_tok.shape == (B, EMBED)
        assert p_tok.dtype == jnp.float16 and c_tok.dtype == jnp.float16
        assert bool(jnp.all(jnp.isfinite(p_tok.astype(jnp.float32))))
        assert bool(jnp.all(jnp.isfinite(c_tok.astype(jnp.float32))))

    print("KERNEL_OK")
</pallas_src>

<mosaic_0001>
module attributes {stable_mosaic.version = 11 : i64} {
  func.func @_matmul_bias_kernel(%arg0: i32, %arg1: i32, %arg2: i32, %arg3: memref<8x192xbf16, #tpu.memory_space<vmem>>, %arg4: memref<192x32xbf16, #tpu.memory_space<vmem>>, %arg5: memref<1x32xf32, #tpu.memory_space<vmem>>, %arg6: memref<8x32xbf16, #tpu.memory_space<vmem>>, %arg7: memref<8x32xf32, #tpu.memory_space<vmem>>) attributes {dimension_semantics = [#tpu.dimension_semantics<parallel>, #tpu.dimension_semantics<parallel>, #tpu.dimension_semantics<arbitrary>], iteration_bounds = array<i64: 1, 1, 1>, scalar_prefetch = 0 : i64, scratch_operands = 1 : i64, tpu.core_type = #tpu.core_type<tc>, window_params = [{transform_indices = @transform_0, window_bounds = array<i64: 8, 192>}, {transform_indices = @transform_1, window_bounds = array<i64: 192, 32>}, {transform_indices = @transform_2, window_bounds = array<i64: 1, 32>}, {transform_indices = @transform_3, window_bounds = array<i64: 8, 32>}]} {
    %c0_i32 = arith.constant 0 : i32
    %0 = arith.cmpi eq, %arg2, %c0_i32 : i32
    %1 = arith.extui %0 : i1 to i32
    %c0_i32_0 = arith.constant 0 : i32
    %2 = arith.cmpi ne, %1, %c0_i32_0 : i32
    scf.if %2 {
      %cst_10 = arith.constant 0.000000e+00 : f32
      %12 = vector.broadcast %cst_10 : f32 to vector<8x32xf32>
      %c0_11 = arith.constant 0 : index
      %c0_12 = arith.constant 0 : index
      %13 = vector.load %arg7[%c0_11, %c0_12] : memref<8x32xf32, #tpu.memory_space<vmem>>, vector<8x32xf32>
      tpu.vector_store %arg7[%c0_11, %c0_12], %12 {strides = array<i32>} : memref<8x32xf32, #tpu.memory_space<vmem>>, vector<8x32xf32>,
    } else {
    }
    %c0 = arith.constant 0 : index
    %c0_1 = arith.constant 0 : index
    %3 = vector.load %arg7[%c0, %c0_1] : memref<8x32xf32, #tpu.memory_space<vmem>>, vector<8x32xf32>
    %c0_2 = arith.constant 0 : index
    %c0_3 = arith.constant 0 : index
    %4 = vector.load %arg3[%c0_2, %c0_3] : memref<8x192xbf16, #tpu.memory_space<vmem>>, vector<8x192xbf16>
    %c0_4 = arith.constant 0 : index
    %c0_5 = arith.constant 0 : index
    %5 = vector.load %arg4[%c0_4, %c0_5] : memref<192x32xbf16, #tpu.memory_space<vmem>>, vector<192x32xbf16>
    %cst = arith.constant dense<0.000000e+00> : vector<8x32xf32>
    %6 = tpu.matmul %4, %5, %cst {dimension_numbers = #tpu.dot_dimension_numbers<[1], [0], [0], [1], [0, 0, 1, 1], [], []>} : vector<8x192xbf16>, vector<192x32xbf16>, vector<8x32xf32> -> vector<8x32xf32>
    %7 = arith.addf %3, %6 : vector<8x32xf32>
    %c0_6 = arith.constant 0 : index
    %c0_7 = arith.constant 0 : index
    %8 = vector.load %arg7[%c0_6, %c0_7] : memref<8x32xf32, #tpu.memory_space<vmem>>, vector<8x32xf32>
    tpu.vector_store %arg7[%c0_6, %c0_7], %7 {strides = array<i32>} : memref<8x32xf32, #tpu.memory_space<vmem>>, vector<8x32xf32>,
    %c0_i32_8 = arith.constant 0 : i32
    %9 = arith.cmpi eq, %arg2, %c0_i32_8 : i32
    %10 = arith.extui %9 : i1 to i32
    %c0_i32_9 = arith.constant 0 : i32
    %11 = arith.cmpi ne, %10, %c0_i32_9 : i32
    scf.if %11 {
      %c0_10 = arith.constant 0 : index
      %c0_11 = arith.constant 0 : index
      %12 = vector.load %arg7[%c0_10, %c0_11] : memref<8x32xf32, #tpu.memory_space<vmem>>, vector<8x32xf32>
      %c0_12 = arith.constant 0 : index
      %c0_13 = arith.constant 0 : index
      %13 = vector.load %arg5[%c0_12, %c0_13] : memref<1x32xf32, #tpu.memory_space<vmem>>, vector<1x32xf32>
      %14 = vector.broadcast %13 : vector<1x32xf32> to vector<8x32xf32>
      %15 = arith.addf %12, %14 : vector<8x32xf32>
      %16 = arith.truncf %15 : vector<8x32xf32> to vector<8x32xbf16>
      %c0_14 = arith.constant 0 : index
      %c0_15 = arith.constant 0 : index
      %17 = vector.load %arg6[%c0_14, %c0_15] : memref<8x32xbf16, #tpu.memory_space<vmem>>, vector<8x32xbf16>
      tpu.vector_store %arg6[%c0_14, %c0_15], %16 {strides = array<i32>} : memref<8x32xbf16, #tpu.memory_space<vmem>>, vector<8x32xbf16>,
    } else {
    }
    return
  }
  func.func @transform_0(%arg0: i32, %arg1: i32, %arg2: i32) -> (i32, i32) {
    %c0_i32 = arith.constant 0 : i32
    return %arg0, %arg2 : i32, i32
  }
  func.func @transform_1(%arg0: i32, %arg1: i32, %arg2: i32) -> (i32, i32) {
    %c0_i32 = arith.constant 0 : i32
    return %arg2, %arg1 : i32, i32
  }
  func.func @transform_2(%arg0: i32, %arg1: i32, %arg2: i32) -> (i32, i32) {
    %c0_i32 = arith.constant 0 : i32
    %c0_i32_0 = arith.constant 0 : i32
    return %c0_i32, %arg1 : i32, i32
  }
  func.func @transform_3(%arg0: i32, %arg1: i32, %arg2: i32) -> (i32, i32) {
    %c0_i32 = arith.constant 0 : i32
    return %arg0, %arg1 : i32, i32
  }
}

</mosaic_0001>

<bundles_post_ra>
// kernel: tpu_custom_call.1
= control target key start
LH: loop header
LB: loop body
LE: loop exit
PB: predicated region body
PF: predicated region fallthrough
CT: control target
= control target key end

     0   :  { %v257_v1 = vmov 0   ;;  %vm20_vm0 = vcmask 261120   ;;  %v258_v3 = vmov 0.0   ;;  %vm126_vm1 = vcmask 523264   ;;  %s327_s0 = inlined_call_operand.vmem [shape: bf16[8,192], index: 0, kind: input, shape index: {}]   ;;  %s328_s1 = inlined_call_operand.vmem [shape: bf16[192,32], index: 1, kind: input, shape index: {}]   ;;  %s329_s2 = inlined_call_operand.vmem [shape: f32[1,32], index: 2, kind: input, shape index: {}]   ;;  %s330_s3 = inlined_call_operand.hbm [shape: bf16[8,32], index: 3, kind: output, shape index: {}]  }
   0x1   :  { %v221_v0 = vld [vmem:[%s328_s1 + $0x38] sm:$0xff]   ;;  %130 = vmatprep.subr.bf16.mxu0 %v257_v1  ;;  %v222_v2 = vld [vmem:[%s328_s1 + $0x30] sm:$0xff]   ;;  %21 = vst.msk [vmem:[#allocation2] sm:$0xff] %vm20_vm0, %v258_v3  ;;  %v223_v4 = vld [vmem:[%s328_s1 + $0x28] sm:$0xff]  }
   0x2   :  { %131 = vmatpush1.bf16.msra.mxu0 %v221_v0  ;;  %v224_v5 = vld [vmem:[%s328_s1 + $0x20] sm:$0xff]  }
   0x3   :  { %132 = vmatprep.subr.bf16.mxu0 %v257_v1  ;;  %v23_v6 = vld [vmem:[%s327_s0] sm:$0xff] }
   0x6   :  { %133 = vmatpush1.bf16.msra.mxu0 %v222_v2 }
   0x7   :  { %134 = vmatprep.subr.bf16.mxu0 %v257_v1 }
   0xa   :  { %135 = vmatpush1.bf16.msra.mxu0 %v223_v4 }
   0xb   :  { %136 = vmatprep.subr.bf16.mxu0 %v257_v1 }
   0xc   :  { %8 = vsyncpa [#allocation4], 0  ;;  %v203_v7 = vcombine.high %v23_v6, %v23_v6  ;;  %v225_v8 = vld [vmem:[%s328_s1 + $0x18] sm:$0xff]   ;;  %v226_v9 = vld [vmem:[%s328_s1 + $0x10] sm:$0xff]   ;;  %v202_v16 = vcombine.low %v23_v6, %v23_v6  ;;  %s259_s12 = smov [#allocation3]   ;;  %vm186_vm2 = vcmask 257024  }
   0xd   :  { %v227_v10 = vld [vmem:[%s328_s1 + $0x8] sm:$0xff]   ;;  %v228_v11 = vld [vmem:[%s328_s1] sm:$0xff]   ;;  %v229_v12 = vld [vmem:[%s328_s1 + $0x58] sm:$0xff]   ;;  %s194_s13 = sshll.u32 %s259_s12, 4  ;;  %s195_s13 = int_to_ptr.vmem [resolvable:$true] %s194_s13 }
   0xe   :  { %137 = vmatpush1.bf16.msra.mxu0 %v224_v5  ;;  %216 = vmatprep.mubr.msk.bf16.mxu0 %vm126_vm1, %v203_v7  ;;  %v230_v13 = vld [vmem:[%s328_s1 + $0x50] sm:$0xff]   ;;  %v231_v14 = vld [vmem:[%s328_s1 + $0x48] sm:$0xff]   ;;  %v232_v15 = vld [vmem:[%s328_s1 + $0x40] sm:$0xff]   ;;  %s235_s1 = scalar_lea.vmem %s195_s13, 64  ;;  %p240_p1 = scmp.lt.s32.totalorder %s195_s13, %s195_s13 }
   0xf   :  { %138 = vmatprep.subr.bf16.mxu0 %v257_v1  ;;  %v22_v17 = vld [vmem:[#allocation2] sm:$0xff]  ;;  %p236_p0 = scmp.ne.s32.totalorder %s195_s13, %s235_s1  ;;  %p241_p2 = scmp.lt.s32.totalorder %s235_s1, %s235_s1 }
  0x10   :  { %v217_v23 = vld [vmem:[%s329_s2] ss:$0 sm:$0xff] }
  0x11   :  { %p242_p3 = por %p241_p2, %p240_p1 }
  0x12   :  { %139 = vmatpush1.bf16.msra.mxu0 %v225_v8 }
  0x13   :  { %140 = vmatprep.subr.bf16.mxu0 %v257_v1  ;;  %p243_p4 = pnand %p242_p3, %p236_p0 }
  0x16   :  { %141 = vmatpush1.bf16.msra.mxu0 %v226_v9 }
  0x17   :  { %142 = vmatprep.subr.bf16.mxu0 %v257_v1 }
  0x1a   :  { %143 = vmatpush1.bf16.msra.mxu0 %v227_v10 }
  0x1b   :  { %144 = vmatprep.subr.bf16.mxu0 %v257_v1 }
  0x1e   :  { %145 = vmatpush1.bf16.msra.mxu0 %v228_v11 }
  0x1f   :  { %154 = vmatprep.subr.bf16.mxu0 %v257_v1 }
  0x22   :  { %155 = vmatpush2.bf16.msra.mxu0 %v229_v12 }
  0x23   :  { %156 = vmatprep.subr.bf16.mxu0 %v257_v1 }
  0x26   :  { %157 = vmatpush2.bf16.msra.mxu0 %v230_v13 }
  0x27   :  { %158 = vmatprep.subr.bf16.mxu0 %v257_v1 }
  0x2a   :  { %159 = vmatpush2.bf16.msra.mxu0 %v231_v14 }
  0x2b   :  { %160 = vmatprep.subr.bf16.mxu0 %v257_v1 }
  0x2e   :  { %161 = vmatpush2.bf16.msra.mxu0 %v232_v15 }
  0x31   :  { %163 = vmatmul.mubr.bf16.vlgmr.msra.gmra.mxu0 %v202_v16 }
  0xf1   :  { %v164_v18 = vpop.f32.mrf.mxu0 }
  0xf2   :  { %v170_v19 = vadd.f32 %v164_v18, %v22_v17 }
  0xf3   :  { %v166_v20 = vpop.f32.mrf.mxu0 }
  0xf4   :  { %172 = vst.msk [vmem:[#allocation2] sm:$0xff] %vm20_vm0, %v170_v19 }
  0xf5   :  { %v167_v21 = vpop.f32.mrf.mxu0 }
  0xf7   :  { %v168_v22 = vpop.f32.mrf.mxu0 }
  0xfb   :  { %v176_v24 = vld [vmem:[#allocation2] sm:$0xff] }
  0xfc   :  { %v184_v25 = vadd.f32 %v217_v23, %v176_v24 }
  0xfe   :  { %v185_v26 = vpack.c.bf16 %v184_v25, %v184_v25 }
 0x100   :  { %187 = vst.msk [vmem:[#allocation3] sm:$0xf] %vm186_vm2, %v185_v26 }
 0x101   :  { %246 = shalt.err (!%p243_p4)
}
 0x102   :  { %197 = dma.vmem_to_hbm [thread:$0]  %s195_s13, 64, %s330_s3, [#allocation4]  }
 0x103   :  { %255 = dma.done.wait [#allocation4], 64  }
 0x104   :  { %256 = vsyncadd [#allocation4], 4294967232 }
 0x105   :  { %201 = vsyncpa [#allocation4], 1 }

</bundles_post_ra>
